<compile_context>
chip_gen: v6e
topology: v6e:2x2x1
jax: 0.10.0
libtpu: 0.0.40
codegen_flags: <defaults>
</compile_context>

<pallas_src>
import jax
import jax.numpy as jnp
from jax.experimental import pallas as pl
from jax.experimental.pallas import tpu as pltpu


def _round_up(x, m):
    return ((x + m - 1) // m) * m


# ----------------------------------------------------------------------------
# Pallas kernel: fused  relu(x @ W + b)  on the MXU (bf16 in, f32 accumulate)
# ----------------------------------------------------------------------------
def _linear_relu_kernel(x_ref, w_ref, b_ref, o_ref):
    acc = jnp.dot(x_ref[...], w_ref[...], preferred_element_type=jnp.float32)
    acc = acc + b_ref[...]
    o_ref[...] = jnp.maximum(acc, 0.0).astype(o_ref.dtype)


def linear_relu(x, w, b, *, out_dtype=jnp.float32):
    """relu(x @ w + b).

    x: (M, K), w: (K, N), b: (N,).  Computed in bf16 on the MXU with f32
    accumulation.  K/N are padded to multiples of 128 (lane-dense), M is
    tiled with a BlockSpec pipeline; padding is sliced off on return.
    """
    M, K = x.shape
    K2, N = w.shape
    assert K2 == K, (K2, K)

    K_pad = _round_up(K, 128)
    N_pad = _round_up(N, 128)
    # M tile: 256 rows for big inputs, otherwise a single 8-aligned block.
    TM = 256 if M > 256 else _round_up(M, 8)
    M_pad = _round_up(M, TM)

    xb = x.astype(jnp.bfloat16)
    if (M_pad, K_pad) != (M, K):
        xb = jnp.pad(xb, ((0, M_pad - M), (0, K_pad - K)))
    wb = w.astype(jnp.bfloat16)
    if (K_pad, N_pad) != (K, N):
        wb = jnp.pad(wb, ((0, K_pad - K), (0, N_pad - N)))
    bb = b.astype(jnp.float32)
    if N_pad != N:
        bb = jnp.pad(bb, (0, N_pad - N))
    bb = bb.reshape(1, N_pad)

    grid_m = M_pad // TM
    out_itemsize = jnp.dtype(out_dtype).itemsize
    cost = pl.CostEstimate(
        flops=2 * M_pad * K_pad * N_pad,
        transcendentals=0,
        bytes_accessed=(M_pad * K_pad * 2 + K_pad * N_pad * 2
                        + M_pad * N_pad * out_itemsize),
    )

    out = pl.pallas_call(
        _linear_relu_kernel,
        out_shape=jax.ShapeDtypeStruct((M_pad, N_pad), out_dtype),
        grid=(grid_m,),
        in_specs=[
            pl.BlockSpec((TM, K_pad), lambda i: (i, 0)),        # x tile
            pl.BlockSpec((K_pad, N_pad), lambda i: (0, 0)),     # whole W
            pl.BlockSpec((1, N_pad), lambda i: (0, 0)),         # bias row
        ],
        out_specs=pl.BlockSpec((TM, N_pad), lambda i: (i, 0)),
        compiler_params=pltpu.CompilerParams(
            dimension_semantics=("parallel",),   # shard M across TCs (v7x)
            vmem_limit_bytes=64 * 1024 * 1024,
        ),
        cost_estimate=cost,
    )(xb, wb, bb)
    return out[:M, :N]


# ----------------------------------------------------------------------------
# Plain-JAX glue: im2col on NHWC (layout plumbing only, no FLOPs)
# ----------------------------------------------------------------------------
# TODO(synk): patch extraction stays as XLA slicing/reshape glue; a fully
# fused in-kernel im2col (strided pl.ds loads over an (OH, OW) grid) would
# remove the expanded HBM copy for large images.
def im2col_nhwc(x, kh, kw, stride):
    """x: (N, H, W, C) -> patches (N*OH*OW, kh*kw*C), K ordering (i, j, c)."""
    N, H, W, C = x.shape
    OH = (H - kh) // stride + 1
    OW = (W - kw) // stride + 1
    cols = []
    for i in range(kh):
        for j in range(kw):
            cols.append(
                x[:, i : i + stride * OH : stride, j : j + stride * OW : stride, :]
            )
    p = jnp.stack(cols, axis=3)               # (N, OH, OW, kh*kw, C)
    p = p.reshape(N * OH * OW, kh * kw * C)
    return p, OH, OW


def conv2d_relu(x, w, b, stride, *, out_dtype=jnp.bfloat16):
    """x: (N, H, W, C) NHWC, w: (OC, IC, KH, KW) torch layout, b: (OC,).

    Returns relu(conv2d(x, w, stride) + b) in NHWC."""
    N = x.shape[0]
    OC, IC, KH, KW = w.shape
    patches, OH, OW = im2col_nhwc(x, KH, KW, stride)      # (N*OH*OW, KH*KW*IC)
    # Match the (i, j, c) K-ordering of the NHWC patches.
    w_mat = w.transpose(2, 3, 1, 0).reshape(KH * KW * IC, OC)
    y = linear_relu(patches, w_mat, b, out_dtype=out_dtype)  # (N*OH*OW, OC)
    return y.reshape(N, OH, OW, OC)


# ----------------------------------------------------------------------------
# CNNLayer forward
# ----------------------------------------------------------------------------
def calc_flatten_size(h, w, f, s):
    return (h - f) // s + 1, (w - f) // s + 1


def init_cnn_params(key, obs_shape, hidden_size):
    """Deterministic synthetic parameter init (shapes match the torch module).

    Biases are zero (nn.init.constant_(bias, 0)); weights are scaled normals
    standing in for orthogonal/xavier init."""
    c, h, w = obs_shape
    fh, fw = calc_flatten_size(h, w, 8, 4)
    fh, fw = calc_flatten_size(fh, fw, 4, 2)
    fh, fw = calc_flatten_size(fh, fw, 3, 1)
    flat_dim = 32 * fh * fw

    k1, k2, k3, k4 = jax.random.split(key, 4)

    def w_init(k, shape):
        fan_in = 1
        for d in shape[1:]:
            fan_in *= d
        return (jax.random.normal(k, shape, jnp.float32)
                * jnp.sqrt(2.0 / fan_in))  # relu gain

    params = {
        "w1": w_init(k1, (32, c, 8, 8)),   "b1": jnp.zeros((32,), jnp.float32),
        "w2": w_init(k2, (64, 32, 4, 4)),  "b2": jnp.zeros((64,), jnp.float32),
        "w3": w_init(k3, (32, 64, 3, 3)),  "b3": jnp.zeros((32,), jnp.float32),
        "w4": w_init(k4, (flat_dim, hidden_size)),
        "b4": jnp.zeros((hidden_size,), jnp.float32),
    }
    return params


def cnn_layer_forward(params, x):
    """x: (N, C, H, W) float32 in [0, 255]. Returns (N, hidden_size) f32."""
    # Single layout conversion to channels-last at the network boundary.
    h = x.transpose(0, 2, 3, 1)                               # NCHW -> NHWC
    # Fold the /255.0 scaling into conv1's (tiny) weights: (x/255)@W == x@(W/255).
    w1 = params["w1"] * jnp.float32(1.0 / 255.0)
    h = conv2d_relu(h, w1, params["b1"], stride=4)            # NHWC, bf16
    h = conv2d_relu(h, params["w2"], params["b2"], stride=2)  # NHWC, bf16
    h = conv2d_relu(h, params["w3"], params["b3"], stride=1)  # NHWC, bf16
    n = h.shape[0]
    # Flatten in PyTorch's NCHW order.
    h = h.transpose(0, 3, 1, 2).reshape(n, -1)
    out = linear_relu(h, params["w4"], params["b4"], out_dtype=jnp.float32)
    return out


if __name__ == "__main__":
    # 36x36 survives the 8/4, 4/2, 3/1 conv stack (36 -> 8 -> 3 -> 1),
    # so flatten dim = 32*1*1 = 32.
    obs_shape = (4, 36, 36)
    hidden_size = 32
    batch = 2

    key = jax.random.PRNGKey(0)
    pkey, xkey = jax.random.split(key)
    params = init_cnn_params(pkey, obs_shape, hidden_size)

    x = jax.random.uniform(
        xkey, (batch,) + obs_shape, dtype=jnp.float32, minval=0.0, maxval=255.0
    )

    out = cnn_layer_forward(params, x)
    out = jax.block_until_ready(out)
    assert out.shape == (batch, hidden_size), out.shape
    assert out.dtype == jnp.float32
    print("KERNEL_OK")
</pallas_src>

<mosaic_0001>
module attributes {stable_mosaic.version = 11 : i64} {
  func.func @_linear_relu_kernel(%arg0: i32, %arg1: memref<128x256xbf16, #tpu.memory_space<vmem>>, %arg2: memref<256x128xbf16, #tpu.memory_space<vmem>>, %arg3: memref<1x128xf32, #tpu.memory_space<vmem>>, %arg4: memref<128x128xbf16, #tpu.memory_space<vmem>>) attributes {dimension_semantics = [#tpu.dimension_semantics<parallel>], iteration_bounds = array<i64: 1>, scalar_prefetch = 0 : i64, scratch_operands = 0 : i64, tpu.core_type = #tpu.core_type<tc>, window_params = [{transform_indices = @transform_0, window_bounds = array<i64: 128, 256>}, {pipeline_mode = #tpu.pipeline_mode<synchronous>, transform_indices = @transform_1, window_bounds = array<i64: 256, 128>}, {pipeline_mode = #tpu.pipeline_mode<synchronous>, transform_indices = @transform_2, window_bounds = array<i64: 1, 128>}, {transform_indices = @transform_3, window_bounds = array<i64: 128, 128>}]} {
    %c0 = arith.constant 0 : index
    %c0_0 = arith.constant 0 : index
    %0 = vector.load %arg1[%c0, %c0_0] : memref<128x256xbf16, #tpu.memory_space<vmem>>, vector<128x256xbf16>
    %c0_1 = arith.constant 0 : index
    %c0_2 = arith.constant 0 : index
    %1 = vector.load %arg2[%c0_1, %c0_2] : memref<256x128xbf16, #tpu.memory_space<vmem>>, vector<256x128xbf16>
    %cst = arith.constant dense<0.000000e+00> : vector<128x128xf32>
    %2 = tpu.matmul %0, %1, %cst {dimension_numbers = #tpu.dot_dimension_numbers<[1], [0], [0], [1], [0, 0, 1, 1], [], []>} : vector<128x256xbf16>, vector<256x128xbf16>, vector<128x128xf32> -> vector<128x128xf32>
    %c0_3 = arith.constant 0 : index
    %c0_4 = arith.constant 0 : index
    %3 = vector.load %arg3[%c0_3, %c0_4] : memref<1x128xf32, #tpu.memory_space<vmem>>, vector<1x128xf32>
    %4 = vector.broadcast %3 : vector<1x128xf32> to vector<128x128xf32>
    %5 = arith.addf %2, %4 : vector<128x128xf32>
    %cst_5 = arith.constant 0.000000e+00 : f32
    %6 = vector.broadcast %cst_5 : f32 to vector<128x128xf32>
    %7 = arith.maximumf %5, %6 : vector<128x128xf32>
    %8 = arith.truncf %7 : vector<128x128xf32> to vector<128x128xbf16>
    %c0_6 = arith.constant 0 : index
    %c0_7 = arith.constant 0 : index
    %9 = vector.load %arg4[%c0_6, %c0_7] : memref<128x128xbf16, #tpu.memory_space<vmem>>, vector<128x128xbf16>
    tpu.vector_store %arg4[%c0_6, %c0_7], %8 {strides = array<i32>} : memref<128x128xbf16, #tpu.memory_space<vmem>>, vector<128x128xbf16>,
    return
  }
  func.func @transform_0(%arg0: i32) -> (i32, i32) {
    %c0_i32 = arith.constant 0 : i32
    %c0_i32_0 = arith.constant 0 : i32
    return %arg0, %c0_i32 : i32, i32
  }
  func.func @transform_1(%arg0: i32) -> (i32, i32) {
    %c0_i32 = arith.constant 0 : i32
    %c0_i32_0 = arith.constant 0 : i32
    %c0_i32_1 = arith.constant 0 : i32
    return %c0_i32, %c0_i32_0 : i32, i32
  }
  func.func @transform_2(%arg0: i32) -> (i32, i32) {
    %c0_i32 = arith.constant 0 : i32
    %c0_i32_0 = arith.constant 0 : i32
    %c0_i32_1 = arith.constant 0 : i32
    return %c0_i32, %c0_i32_0 : i32, i32
  }
  func.func @transform_3(%arg0: i32) -> (i32, i32) {
    %c0_i32 = arith.constant 0 : i32
    %c0_i32_0 = arith.constant 0 : i32
    return %arg0, %c0_i32 : i32, i32
  }
}

</mosaic_0001>

<bundles_post_ra>
// kernel: tpu_custom_call.1
= control target key start
LH: loop header
LB: loop body
LE: loop exit
PB: predicated region body
PF: predicated region fallthrough
CT: control target
= control target key end

     0   :  { %8 = vsyncpa [#allocation3], 0  ;;  %s854_s0 = inlined_call_operand.hbm [shape: bf16[128,256], index: 0, kind: input, shape index: {}]   ;;  %s855_s1 = inlined_call_operand.hbm [shape: bf16[256,128], index: 1, kind: input, shape index: {}]   ;;  %s856_s2 = inlined_call_operand.vmem [shape: f32[1,128], index: 2, kind: input, shape index: {}]   ;;  %s857_s3 = inlined_call_operand.hbm [shape: bf16[128,128], index: 3, kind: output, shape index: {}]  }
   0x1   :  { %9 = vsyncpa [#allocation6], 0 }
   0x2   :  { %10 = vsyncpa [#allocation4], 0  ;;  %s791_s12 = smov [#allocation2]  }
   0x3   :  { %s16_s13 = sshll.u32 %s791_s12, 4  ;;  %s17_s13 = int_to_ptr.vmem [resolvable:$true] %s16_s13 }
   0x4   :  { %s733_s14 = scalar_lea.vmem %s17_s13, 2048  ;;  %p738_p1 = scmp.lt.s32.totalorder %s17_s13, %s17_s13 }
   0x5   :  { %p734_p0 = scmp.ne.s32.totalorder %s17_s13, %s733_s14  ;;  %p739_p2 = scmp.lt.s32.totalorder %s733_s14, %s733_s14 }
   0x7   :  { %p740_p3 = por %p739_p2, %p738_p1 }
   0x9   :  { %p741_p4 = pnand %p740_p3, %p734_p0 }
   0xb   :  { %744 = shalt.err (!%p741_p4)
}
   0xc   :  { %s792_s15 = smov 128   ;;  %s793_s16 = smov 8  }
   0xd   :  { %22 = dma.hbm_to_vmem [thread:$0]  %s854_s0, 2048, %s17_s13, [#allocation3], %s792_s15, %s792_s15, %s793_s16  }
   0xe   :  { %s794_s19 = smov [#allocation5]  }
   0xf   :  { %s28_s20 = sshll.u32 %s794_s19, 4  ;;  %s29_s20 = int_to_ptr.vmem [resolvable:$true] %s28_s20 }
  0x10   :  { %s753_s21 = scalar_lea.vmem %s29_s20, 2048  ;;  %p758_p6 = scmp.lt.s32.totalorder %s29_s20, %s29_s20 }
  0x11   :  { %p754_p5 = scmp.ne.s32.totalorder %s29_s20, %s753_s21  ;;  %p759_p7 = scmp.lt.s32.totalorder %s753_s21, %s753_s21 }
  0x13   :  { %p760_p8 = por %p759_p7, %p758_p6 }
  0x15   :  { %p761_p9 = pnand %p760_p8, %p754_p5 }
  0x17   :  { %764 = shalt.err (!%p761_p9)
}
  0x18   :  { %s795_s22 = smov 64   ;;  %s796_s23 = smov 4  }
  0x19   :  { %34 = dma.hbm_to_vmem [thread:$0]  %s855_s1, 2048, %s29_s20, [#allocation6], %s795_s22, %s795_s22, %s796_s23  }
  0x1a   :  { %785 = dma.done.wait [#allocation3], 2048  }
  0x1b   :  { %786 = vsyncadd [#allocation3], 4294965248 }
  0x1c   :  { %787 = dma.done.wait [#allocation6], 2048  }
  0x1d   :  { %788 = vsyncadd [#allocation6], 4294965248  ;;  %v685_v0 = vld [vmem:[#allocation5 + $0x78] sm:$0xff]   ;;  %v687_v2 = vld [vmem:[#allocation5 + $0x70] sm:$0xff]  }
  0x1e   :  { %v686_v1 = vld [vmem:[#allocation5 + $0x38] sm:$0xff]   ;;  %598 = vmatprep.subr.bf16.mxu0 %v685_v0  ;;  %662 = vmatprep.subr.bf16.mxu1 %v685_v0  ;;  %v688_v3 = vld [vmem:[#allocation5 + $0x30] sm:$0xff]   ;;  %v689_v4 = vld [vmem:[#allocation5 + $0x68] sm:$0xff]  }
  0x1f   :  { %599 = vmatpush3.bf16.msra.mxu0 %v686_v1  ;;  %670 = vmatpush3.bf16.msra.mxu1 %v686_v1  ;;  %v690_v5 = vld [vmem:[#allocation5 + $0x28] sm:$0xff]   ;;  %v691_v6 = vld [vmem:[#allocation5 + $0x60] sm:$0xff]   ;;  %v693_v8 = vld [vmem:[#allocation5 + $0x58] sm:$0xff]  }
  0x20   :  { %600 = vmatprep.subr.bf16.mxu0 %v687_v2  ;;  %663 = vmatprep.subr.bf16.mxu1 %v687_v2  ;;  %v692_v7 = vld [vmem:[#allocation5 + $0x20] sm:$0xff]   ;;  %v694_v9 = vld [vmem:[#allocation5 + $0x18] sm:$0xff]   ;;  %v695_v10 = vld [vmem:[#allocation5 + $0x50] sm:$0xff]  }
  0x21   :  { %v703_v11 = vld [vmem:[#allocation2 + $0x4] ss:$8 sps:$4 sm:$0xff]   ;;  %v696_v13 = vld [vmem:[#allocation5 + $0x10] sm:$0xff]   ;;  %v701_v18 = vld [vmem:[#allocation2] ss:$8 sps:$4 sm:$0xff]  }
  0x22   :  { %v706_v12 = vld [vmem:[#allocation2 + $0x44] ss:$8 sps:$4 sm:$0xff]   ;;  %307 = vmatprep.mubr.bf16.mxu0 %v703_v11  ;;  %v704_v19 = vld [vmem:[#allocation2 + $0x40] ss:$8 sps:$4 sm:$0xff]   ;;  %v707_v20 = vld [vmem:[#allocation2 + $0x14] ss:$8 sps:$4 sm:$0xff]  }
  0x23   :  { %601 = vmatpush3.bf16.msra.mxu0 %v688_v3  ;;  %671 = vmatpush3.bf16.msra.mxu1 %v688_v3  ;;  %v697_v14 = vld [vmem:[#allocation5 + $0x48] sm:$0xff]   ;;  %v699_v16 = vld [vmem:[#allocation5 + $0x40] sm:$0xff]   ;;  %v709_v21 = vld [vmem:[#allocation2 + $0x54] ss:$8 sps:$4 sm:$0xff]  }
  0x24   :  { %602 = vmatprep.subr.bf16.mxu0 %v689_v4  ;;  %664 = vmatprep.subr.bf16.mxu1 %v689_v4  ;;  %v698_v15 = vld [vmem:[#allocation5 + $0x8] sm:$0xff]   ;;  %v700_v17 = vld [vmem:[#allocation5] sm:$0xff]   ;;  %v711_v22 = vld [vmem:[#allocation2 + $0x10] ss:$8 sps:$4 sm:$0xff]  }
  0x25   :  { %339 = vmatprep.mubr.bf16.mxu1 %v706_v12  ;;  %v712_v23 = vld [vmem:[#allocation2 + $0x50] ss:$8 sps:$4 sm:$0xff]   ;;  %v713_v24 = vld [vmem:[#allocation2 + $0x24] ss:$8 sps:$4 sm:$0xff]   ;;  %v717_v26 = vld [vmem:[#allocation2 + $0x20] ss:$8 sps:$4 sm:$0xff]  }
  0x26   :  { %v715_v25 = vld [vmem:[#allocation2 + $0x64] ss:$8 sps:$4 sm:$0xff]   ;;  %v718_v27 = vld [vmem:[#allocation2 + $0x60] ss:$8 sps:$4 sm:$0xff]   ;;  %v719_v28 = vld [vmem:[#allocation2 + $0x34] ss:$8 sps:$4 sm:$0xff]  }
  0x27   :  { %603 = vmatpush3.bf16.msra.mxu0 %v690_v5  ;;  %672 = vmatpush3.bf16.msra.mxu1 %v690_v5  ;;  %v721_v29 = vld [vmem:[#allocation2 + $0x74] ss:$8 sps:$4 sm:$0xff]   ;;  %v723_v30 = vld [vmem:[#allocation2 + $0x30] ss:$8 sps:$4 sm:$0xff]   ;;  %v830_v36 = vld [vmem:[%s856_s2] ss:$0 sm:$0xff] }
  0x28   :  { %604 = vmatprep.subr.bf16.mxu0 %v691_v6  ;;  %665 = vmatprep.subr.bf16.mxu1 %v691_v6  ;;  %v724_v31 = vld [vmem:[#allocation2 + $0x70] ss:$8 sps:$4 sm:$0xff]   ;;  %s797_s2 = smov [#allocation7]  }
  0x29   :  { %s473_s26 = sshll.u32 %s797_s2, 4  ;;  %s474_s26 = int_to_ptr.vmem [resolvable:$true] %s473_s26 }
  0x2a   :  { %s765_s27 = scalar_lea.vmem %s474_s26, 1024  ;;  %p770_p11 = scmp.lt.s32.totalorder %s474_s26, %s474_s26 }
  0x2b   :  { %605 = vmatpush3.bf16.msra.mxu0 %v692_v7  ;;  %673 = vmatpush3.bf16.msra.mxu1 %v692_v7  ;;  %p766_p10 = scmp.ne.s32.totalorder %s474_s26, %s765_s27  ;;  %p771_p12 = scmp.lt.s32.totalorder %s765_s27, %s765_s27 }
  0x2c   :  { %606 = vmatprep.subr.bf16.mxu0 %v693_v8  ;;  %666 = vmatprep.subr.bf16.mxu1 %v693_v8 }
  0x2d   :  { %p772_p13 = por %p771_p12, %p770_p11 }
  0x2f   :  { %607 = vmatpush3.bf16.msra.mxu0 %v694_v9  ;;  %674 = vmatpush3.bf16.msra.mxu1 %v694_v9  ;;  %p773_p0 = pnand %p772_p13, %p766_p10 }
  0x30   :  { %608 = vmatprep.subr.bf16.mxu0 %v695_v10  ;;  %667 = vmatprep.subr.bf16.mxu1 %v695_v10 }
  0x33   :  { %609 = vmatpush3.bf16.msra.mxu0 %v696_v13  ;;  %675 = vmatpush3.bf16.msra.mxu1 %v696_v13 }
  0x34   :  { %610 = vmatprep.subr.bf16.mxu0 %v697_v14  ;;  %668 = vmatprep.subr.bf16.mxu1 %v697_v14 }
  0x37   :  { %611 = vmatpush3.bf16.msra.mxu0 %v698_v15  ;;  %676 = vmatpush3.bf16.msra.mxu1 %v698_v15 }
  0x38   :  { %612 = vmatprep.subr.bf16.mxu0 %v699_v16  ;;  %669 = vmatprep.subr.bf16.mxu1 %v699_v16 }
  0x3b   :  { %613 = vmatpush3.bf16.msra.mxu0 %v700_v17  ;;  %677 = vmatpush3.bf16.msra.mxu1 %v700_v17 }
  0x3e   :  { %308 = vmatmul.mubr.bf16.vlgmr.msra.gmra.mxu0 %v701_v18  ;;  %340 = vmatmul.mubr.bf16.vlgmr.msra.gmra.mxu1 %v704_v19 }
  0x3f   :  { %315 = vmatprep.mubr.bf16.mxu0 %v707_v20  ;;  %347 = vmatprep.mubr.bf16.mxu1 %v709_v21 }
  0x46   :  { %316 = vmatmul.mubr.bf16.gmra.mxu0 %v711_v22  ;;  %348 = vmatmul.mubr.bf16.gmra.mxu1 %v712_v23 }
  0x47   :  { %323 = vmatprep.mubr.bf16.mxu0 %v713_v24  ;;  %355 = vmatprep.mubr.bf16.mxu1 %v715_v25 }
  0x4e   :  { %324 = vmatmul.mubr.bf16.gmra.mxu0 %v717_v26  ;;  %356 = vmatmul.mubr.bf16.gmra.mxu1 %v718_v27 }
  0x4f   :  { %331 = vmatprep.mubr.bf16.mxu0 %v719_v28  ;;  %363 = vmatprep.mubr.bf16.mxu1 %v721_v29 }
  0x56   :  { %332 = vmatmul.mubr.bf16.gmra.mxu0 %v723_v30  ;;  %364 = vmatmul.mubr.bf16.gmra.mxu1 %v724_v31 }
  0xfe   :  { %v614_v32 = vpop.f32.mrf.mxu0  ;;  %v638_v33 = vpop.f32.mrf.mxu1 }
 0x100   :  { %v615_v34 = vpop.f32.mrf.mxu0  ;;  %v639_v35 = vpop.f32.mrf.mxu1 }
 0x101   :  { %v616_v37 = vadd.f32 %v615_v34, %v614_v32  ;;  %v640_v38 = vadd.f32 %v639_v35, %v638_v33 }
 0x102   :  { %v617_v39 = vpop.f32.mrf.mxu0  ;;  %v641_v40 = vpop.f32.mrf.mxu1 }
 0x103   :  { %v310_v41 = vadd.f32 %v616_v37, %v830_v36  ;;  %v342_v42 = vadd.f32 %v640_v38, %v830_v36 }
 0x104   :  { %v618_v43 = vpop.f32.mrf.mxu0  ;;  %v642_v44 = vpop.f32.mrf.mxu1 }
 0x105   :  { %v619_v45 = vadd.f32 %v618_v43, %v617_v39  ;;  %v643_v46 = vadd.f32 %v642_v44, %v641_v40  ;;  %v372_v51 = vmax.f32 %v310_v41, 0.0  ;;  %v380_v52 = vmax.f32 %v342_v42, 0.0 }
 0x106   :  { %v620_v47 = vpop.f32.mrf.mxu0  ;;  %v644_v48 = vpop.f32.mrf.mxu1 }
 0x107   :  { %v313_v49 = vadd.f32 %v619_v45, %v830_v36  ;;  %v345_v50 = vadd.f32 %v643_v46, %v830_v36 }
 0x108   :  { %v621_v53 = vpop.f32.mrf.mxu0  ;;  %v645_v54 = vpop.f32.mrf.mxu1 }
 0x109   :  { %v373_v55 = vmax.f32 %v313_v49, 0.0  ;;  %v381_v56 = vmax.f32 %v345_v50, 0.0  ;;  %v622_v57 = vadd.f32 %v621_v53, %v620_v47  ;;  %v646_v58 = vadd.f32 %v645_v54, %v644_v48 }
 0x10a   :  { %v623_v59 = vpop.f32.mrf.mxu0  ;;  %v647_v60 = vpop.f32.mrf.mxu1 }
 0x10b   :  { %v554_v61 = vpack.c.bf16 %v373_v55, %v372_v51  ;;  %v574_v62 = vpack.c.bf16 %v381_v56, %v380_v52  ;;  %v318_v63 = vadd.f32 %v622_v57, %v830_v36  ;;  %v350_v0 = vadd.f32 %v646_v58, %v830_v36 }
 0x10c   :  { %v624_v1 = vpop.f32.mrf.mxu0  ;;  %v648_v2 = vpop.f32.mrf.mxu1 }
 0x10d   :  { %555 = vst [vmem:[#allocation7] sm:$0xff] %v554_v61   ;;  %594 = vst [vmem:[#allocation7 + $0x20] sm:$0xff] %v574_v62   ;;  %v625_v3 = vadd.f32 %v624_v1, %v623_v59  ;;  %v649_v4 = vadd.f32 %v648_v2, %v647_v60  ;;  %v374_v9 = vmax.f32 %v318_v63, 0.0  ;;  %v382_v10 = vmax.f32 %v350_v0, 0.0 }
 0x10e   :  { %v626_v5 = vpop.f32.mrf.mxu0  ;;  %v650_v6 = vpop.f32.mrf.mxu1 }
 0x10f   :  { %v321_v7 = vadd.f32 %v625_v3, %v830_v36  ;;  %v353_v8 = vadd.f32 %v649_v4, %v830_v36 }
 0x110   :  { %v627_v11 = vpop.f32.mrf.mxu0  ;;  %v651_v12 = vpop.f32.mrf.mxu1 }
 0x111   :  { %v375_v13 = vmax.f32 %v321_v7, 0.0  ;;  %v383_v14 = vmax.f32 %v353_v8, 0.0  ;;  %v628_v15 = vadd.f32 %v627_v11, %v626_v5  ;;  %v652_v16 = vadd.f32 %v651_v12, %v650_v6 }
 0x112   :  { %v629_v17 = vpop.f32.mrf.mxu0  ;;  %v653_v18 = vpop.f32.mrf.mxu1 }
 0x113   :  { %v559_v19 = vpack.c.bf16 %v375_v13, %v374_v9  ;;  %v579_v20 = vpack.c.bf16 %v383_v14, %v382_v10  ;;  %v326_v21 = vadd.f32 %v628_v15, %v830_v36  ;;  %v358_v22 = vadd.f32 %v652_v16, %v830_v36 }
 0x114   :  { %v630_v23 = vpop.f32.mrf.mxu0  ;;  %v654_v24 = vpop.f32.mrf.mxu1 }
 0x115   :  { %591 = vst [vmem:[#allocation7 + $0x8] sm:$0xff] %v559_v19   ;;  %595 = vst [vmem:[#allocation7 + $0x28] sm:$0xff] %v579_v20   ;;  %v631_v25 = vadd.f32 %v630_v23, %v629_v17  ;;  %v655_v26 = vadd.f32 %v654_v24, %v653_v18  ;;  %v376_v31 = vmax.f32 %v326_v21, 0.0  ;;  %v384_v32 = vmax.f32 %v358_v22, 0.0 }
 0x116   :  { %v632_v27 = vpop.f32.mrf.mxu0  ;;  %v656_v28 = vpop.f32.mrf.mxu1 }
 0x117   :  { %v329_v29 = vadd.f32 %v631_v25, %v830_v36  ;;  %v361_v30 = vadd.f32 %v655_v26, %v830_v36 }
 0x118   :  { %v633_v33 = vpop.f32.mrf.mxu0  ;;  %v657_v34 = vpop.f32.mrf.mxu1 }
 0x119   :  { %v377_v35 = vmax.f32 %v329_v29, 0.0  ;;  %v385_v37 = vmax.f32 %v361_v30, 0.0  ;;  %v634_v38 = vadd.f32 %v633_v33, %v632_v27  ;;  %v658_v39 = vadd.f32 %v657_v34, %v656_v28 }
 0x11a   :  { %v635_v40 = vpop.f32.mrf.mxu0  ;;  %v659_v41 = vpop.f32.mrf.mxu1 }
 0x11b   :  { %v564_v42 = vpack.c.bf16 %v377_v35, %v376_v31  ;;  %v584_v43 = vpack.c.bf16 %v385_v37, %v384_v32  ;;  %v334_v46 = vadd.f32 %v634_v38, %v830_v36  ;;  %v366_v47 = vadd.f32 %v658_v39, %v830_v36 }
 0x11c   :  { %v636_v44 = vpop.f32.mrf.mxu0  ;;  %v660_v45 = vpop.f32.mrf.mxu1 }
 0x11d   :  { %592 = vst [vmem:[#allocation7 + $0x10] sm:$0xff] %v564_v42   ;;  %596 = vst [vmem:[#allocation7 + $0x30] sm:$0xff] %v584_v43   ;;  %v637_v48 = vadd.f32 %v636_v44, %v635_v40  ;;  %v661_v49 = vadd.f32 %v660_v45, %v659_v41  ;;  %v378_v52 = vmax.f32 %v334_v46, 0.0  ;;  %v386_v53 = vmax.f32 %v366_v47, 0.0 }
 0x11f   :  { %v337_v50 = vadd.f32 %v637_v48, %v830_v36  ;;  %v369_v51 = vadd.f32 %v661_v49, %v830_v36 }
 0x121   :  { %v379_v54 = vmax.f32 %v337_v50, 0.0  ;;  %v387_v55 = vmax.f32 %v369_v51, 0.0 }
 0x123   :  { %v569_v56 = vpack.c.bf16 %v379_v54, %v378_v52  ;;  %v589_v57 = vpack.c.bf16 %v387_v55, %v386_v53 }
 0x125   :  { %593 = vst [vmem:[#allocation7 + $0x18] sm:$0xff] %v569_v56   ;;  %597 = vst [vmem:[#allocation7 + $0x38] sm:$0xff] %v589_v57  }
 0x126   :  { %776 = shalt.err (!%p773_p0)
}
 0x127   :  { %479 = dma.vmem_to_hbm [thread:$0]  %s474_s26, 1024, %s857_s3, [#allocation4], %s795_s22, %s795_s22, %s796_s23  }
 0x128   :  { %789 = dma.done.wait [#allocation4], 1024  }
 0x129   :  { %790 = vsyncadd [#allocation4], 4294966272 }
 0x12a   :  { %483 = vsyncpa [#allocation3], 1 }
 0x12b   :  { %484 = vsyncpa [#allocation6], 1 }
 0x12c   :  { %485 = vsyncpa [#allocation4], 1 }

</bundles_post_ra>
